<compile_context>
chip_gen: v7x
topology: tpu7x:2x2x1
jax: 0.10.0
libtpu: 0.0.40
codegen_flags: <defaults>
</compile_context>

<pallas_src>
import functools

import jax
import jax.numpy as jnp
from jax.experimental import pallas as pl
from jax.experimental.pallas import tpu as pltpu


def _round_up(x, m):
    return ((x + m - 1) // m) * m


# ----------------------------------------------------------------------------
# Pallas kernel: one batch tile of the fused MLP (all layers + softmax)
# ----------------------------------------------------------------------------
def _mlp_fused_kernel(x_ref, slab_ref, prelu_ref, out_ref, *, pad, n_layers, n_out):
    """x_ref    : [B_tile, PAD] f32  (zero-padded features, lane-dense)
       slab_ref : [L*(PAD+8), PAD] f32 packed params; layer l uses rows
                  [l*(PAD+8), l*(PAD+8)+PAD) = W_l^T (zero-padded) and row
                  l*(PAD+8)+PAD = bias_l (zero-padded).
       prelu_ref: [max(L-1,1)] f32 in SMEM (one PReLU slope per hidden layer)
       out_ref  : [B_tile, PAD] f32 per-row softmax probs (pad lanes are 0)
    """
    h = x_ref[...]                                              # [B_tile, PAD] f32
    for l in range(n_layers):                                   # statically unrolled
        r0 = l * (pad + 8)
        w = slab_ref[r0:r0 + pad, :]                            # [PAD, PAD] static view
        b = slab_ref[r0 + pad:r0 + pad + 1, :]                  # [1, PAD]
        # bf16 operands feed the MXU fast path on v6e/v7x; accumulate in f32.
        h = jnp.dot(h.astype(jnp.bfloat16), w.astype(jnp.bfloat16),
                    preferred_element_type=jnp.float32) + b
        if l < n_layers - 1:                                    # PReLU between layers
            a = prelu_ref[l]                                    # scalar from SMEM
            h = jnp.where(h > 0, h, a * h)                      # f32 on the VPU

    # Per-row softmax over the real n_out logits; pad lanes masked out so they
    # do not contribute exp(0) terms to the denominator.
    lane = jax.lax.broadcasted_iota(jnp.int32, h.shape, 1)
    logits = jnp.where(lane < n_out, h, jnp.float32(-1e30))
    m = jnp.max(logits, axis=-1, keepdims=True)
    e = jnp.exp(logits - m)
    denom = jnp.sum(e, axis=-1, keepdims=True)
    out_ref[...] = (e / denom).astype(out_ref.dtype)            # exact division


# ----------------------------------------------------------------------------
# pallas_call wrapper
# ----------------------------------------------------------------------------
def mlp_forward_pallas(x, params, *, batch_tile=256):
    """Batched MLP forward. x: [B, 2*N*N] (or a single 1-D flattened state)."""
    weights = params["weights"]        # torch-style [fan_out, fan_in]
    biases = params["biases"]          # [fan_out]
    prelu = params["prelu"]            # [L-1]
    n_layers = len(weights)
    n_out = weights[0 - 1].shape[0]
    d_in = weights[0].shape[1]

    single = (x.ndim == 1)
    x2 = (x.reshape(1, -1) if single else x).astype(jnp.float32)
    B = x2.shape[0]
    assert x2.shape[1] == d_in

    dims = [d_in] + [w.shape[0] for w in weights]
    PAD = _round_up(max(dims), 128)                 # lane-dense width everywhere

    # Batch tiling: sublane multiple of 8, cap at batch_tile rows per grid step.
    b_tile = min(batch_tile, _round_up(B, 8))
    b_pad = _round_up(B, b_tile)
    num_tiles = b_pad // b_tile

    # Zero-padded input tile slab.
    x_p = jnp.zeros((b_pad, PAD), jnp.float32).at[:B, :d_in].set(x2)

    # One packed parameter slab -> a single HBM->VMEM DMA for all weights+biases.
    rows_per_layer = PAD + 8
    slab = jnp.zeros((n_layers * rows_per_layer, PAD), jnp.float32)
    for l, (w, b) in enumerate(zip(weights, biases)):
        fo, fi = w.shape
        r0 = l * rows_per_layer
        slab = slab.at[r0:r0 + fi, :fo].set(w.T.astype(jnp.float32))
        slab = slab.at[r0 + PAD, :fo].set(b.astype(jnp.float32))

    prelu_1d = prelu.reshape(-1).astype(jnp.float32)
    if prelu_1d.shape[0] == 0:
        prelu_1d = jnp.zeros((1,), jnp.float32)

    kernel = functools.partial(_mlp_fused_kernel, pad=PAD,
                               n_layers=n_layers, n_out=n_out)

    cost = pl.CostEstimate(
        flops=int(2 * b_pad * n_layers * PAD * PAD),
        transcendentals=int(b_pad * PAD),
        bytes_accessed=int(x_p.size * 4 + slab.size * 4 + b_pad * PAD * 4),
    )

    out = pl.pallas_call(
        kernel,
        out_shape=jax.ShapeDtypeStruct((b_pad, PAD), jnp.float32),
        grid=(num_tiles,),
        in_specs=[
            pl.BlockSpec((b_tile, PAD), lambda i: (i, 0)),          # batch tile
            pl.BlockSpec(slab.shape, lambda i: (0, 0)),             # resident params
            pl.BlockSpec(memory_space=pltpu.MemorySpace.SMEM),      # PReLU scalars
        ],
        out_specs=pl.BlockSpec((b_tile, PAD), lambda i: (i, 0)),
        compiler_params=pltpu.CompilerParams(
            dimension_semantics=("parallel",)),                     # megacore on v7x
        cost_estimate=cost,
    )(x_p, slab, prelu_1d)

    probs = out[:B, :n_out]
    return probs[0] if single else probs


# ----------------------------------------------------------------------------
# Parameter construction (deterministic, mimics torch nn.Linear / nn.PReLU)
# ----------------------------------------------------------------------------
def make_mlp_params(key, num_variables, n_hidden):
    num_variables = int(num_variables)
    nodes_in = [2 * num_variables * num_variables] + list(n_hidden)
    nodes_out = list(n_hidden) + [num_variables]
    weights, biases = [], []
    for fan_in, fan_out in zip(nodes_in, nodes_out):
        key, kw, kb = jax.random.split(key, 3)
        bound = 1.0 / jnp.sqrt(jnp.float32(fan_in))       # torch Linear default init
        weights.append(jax.random.uniform(kw, (fan_out, fan_in), jnp.float32,
                                          -bound, bound))
        biases.append(jax.random.uniform(kb, (fan_out,), jnp.float32, -bound, bound))
    # nn.PReLU() default init is 0.25; use distinct per-layer values so the
    # in-kernel layer indexing is exercised by the reference check.
    n_prelu = len(n_hidden)
    prelu = 0.25 + 0.05 * jnp.arange(n_prelu, dtype=jnp.float32)
    return {"weights": weights, "biases": biases, "prelu": prelu}


# ----------------------------------------------------------------------------
# Pure-JAX f32 reference (same math, no Pallas / no bf16) for correctness
# ----------------------------------------------------------------------------
def mlp_reference(x, params):
    weights, biases, prelu = params["weights"], params["biases"], params["prelu"]
    h = (x.reshape(1, -1) if x.ndim == 1 else x).astype(jnp.float32)
    L = len(weights)
    for l in range(L):
        h = h @ weights[l].T + biases[l][None, :]
        if l < L - 1:
            h = jnp.where(h > 0, h, prelu[l] * h)
    p = jax.nn.softmax(h, axis=-1)
    return p[0] if x.ndim == 1 else p


# TODO(synk): MLP.act's torch.multinomial sampling / log-prob return is not
# ported (forward pass only).

# ----------------------------------------------------------------------------
if __name__ == "__main__":
    N = 8                   # num_variables -> input dim 2*N*N = 128, output dim N
    N_HIDDEN = [64, 32]     # Linear(128,64)+PReLU, Linear(64,32)+PReLU, Linear(32,8), Softmax
    B = 4                   # small batch of flattened states (batched M dimension)

    key = jax.random.PRNGKey(0)
    k_state, k_params = jax.random.split(key)

    # mimic MLP.act: each state has 2*N*N entries, forward sees state.flatten()
    states = jax.random.normal(k_state, (B, 2, N, N), jnp.float32)
    x = states.reshape(B, -1)                                  # [B, 128]

    params = make_mlp_params(k_params, N, N_HIDDEN)

    # Batched path
    probs = mlp_forward_pallas(x, params)
    probs = jax.block_until_ready(probs)
    ref = mlp_reference(x, params)

    assert probs.shape == (B, N)
    assert bool(jnp.isfinite(probs).all())
    assert float(jnp.max(jnp.abs(probs.sum(-1) - 1.0))) < 1e-4       # exact division
    assert float(jnp.max(jnp.abs(probs - ref))) < 2e-2               # bf16 MXU vs f32 ref

    # Single flattened-state path (as used by MLP.act)
    p1 = jax.block_until_ready(mlp_forward_pallas(x[0], params))
    r1 = mlp_reference(x[0], params)
    assert p1.shape == (N,)
    assert float(jnp.max(jnp.abs(p1 - r1))) < 2e-2

    print("KERNEL_OK")
</pallas_src>

<mosaic_0001>
module attributes {stable_mosaic.version = 11 : i64} {
  func.func @_mlp_fused_kernel(%arg0: i32, %arg1: memref<8x128xf32, #tpu.memory_space<vmem>>, %arg2: memref<408x128xf32, #tpu.memory_space<vmem>>, %arg3: memref<2xf32, #tpu.memory_space<smem>>, %arg4: memref<8x128xf32, #tpu.memory_space<vmem>>) attributes {dimension_semantics = [#tpu.dimension_semantics<parallel>], iteration_bounds = array<i64: 1>, scalar_prefetch = 0 : i64, scratch_operands = 0 : i64, tpu.core_type = #tpu.core_type<tc>, window_params = [{transform_indices = @transform_0, window_bounds = array<i64: 8, 128>}, {pipeline_mode = #tpu.pipeline_mode<synchronous>, transform_indices = @transform_1, window_bounds = array<i64: 408, 128>}, {transform_indices = @transform_2, window_bounds = array<i64: 2>}, {transform_indices = @transform_3, window_bounds = array<i64: 8, 128>}]} {
    %c0 = arith.constant 0 : index
    %c0_0 = arith.constant 0 : index
    %0 = vector.load %arg1[%c0, %c0_0] : memref<8x128xf32, #tpu.memory_space<vmem>>, vector<8x128xf32>
    %c0_1 = arith.constant 0 : index
    %c0_2 = arith.constant 0 : index
    %1 = vector.load %arg2[%c0_1, %c0_2] : memref<408x128xf32, #tpu.memory_space<vmem>>, vector<128x128xf32>
    %c128 = arith.constant 128 : index
    %c0_3 = arith.constant 0 : index
    %2 = vector.load %arg2[%c128, %c0_3] : memref<408x128xf32, #tpu.memory_space<vmem>>, vector<1x128xf32>
    %3 = arith.truncf %0 : vector<8x128xf32> to vector<8x128xbf16>
    %4 = arith.truncf %1 : vector<128x128xf32> to vector<128x128xbf16>
    %cst = arith.constant dense<0.000000e+00> : vector<8x128xf32>
    %5 = tpu.matmul %3, %4, %cst {dimension_numbers = #tpu.dot_dimension_numbers<[1], [0], [0], [1], [0, 0, 1, 1], [], []>} : vector<8x128xbf16>, vector<128x128xbf16>, vector<8x128xf32> -> vector<8x128xf32>
    %6 = vector.broadcast %2 : vector<1x128xf32> to vector<8x128xf32>
    %7 = arith.addf %5, %6 : vector<8x128xf32>
    %c0_4 = arith.constant 0 : index
    %8 = memref.load %arg3[%c0_4] : memref<2xf32, #tpu.memory_space<smem>>
    %cst_5 = arith.constant 0.000000e+00 : f32
    %9 = vector.broadcast %cst_5 : f32 to vector<8x128xf32>
    %10 = arith.cmpf ogt, %7, %9 : vector<8x128xf32>
    %11 = vector.broadcast %8 : f32 to vector<8x128xf32>
    %12 = arith.mulf %11, %7 : vector<8x128xf32>
    %13 = arith.select %10, %7, %12 : vector<8x128xi1>, vector<8x128xf32>
    %c136 = arith.constant 136 : index
    %c0_6 = arith.constant 0 : index
    %14 = vector.load %arg2[%c136, %c0_6] : memref<408x128xf32, #tpu.memory_space<vmem>>, vector<128x128xf32>
    %c264 = arith.constant 264 : index
    %c0_7 = arith.constant 0 : index
    %15 = vector.load %arg2[%c264, %c0_7] : memref<408x128xf32, #tpu.memory_space<vmem>>, vector<1x128xf32>
    %16 = arith.truncf %13 : vector<8x128xf32> to vector<8x128xbf16>
    %17 = arith.truncf %14 : vector<128x128xf32> to vector<128x128xbf16>
    %cst_8 = arith.constant dense<0.000000e+00> : vector<8x128xf32>
    %18 = tpu.matmul %16, %17, %cst_8 {dimension_numbers = #tpu.dot_dimension_numbers<[1], [0], [0], [1], [0, 0, 1, 1], [], []>} : vector<8x128xbf16>, vector<128x128xbf16>, vector<8x128xf32> -> vector<8x128xf32>
    %19 = vector.broadcast %15 : vector<1x128xf32> to vector<8x128xf32>
    %20 = arith.addf %18, %19 : vector<8x128xf32>
    %c1 = arith.constant 1 : index
    %21 = memref.load %arg3[%c1] : memref<2xf32, #tpu.memory_space<smem>>
    %cst_9 = arith.constant 0.000000e+00 : f32
    %22 = vector.broadcast %cst_9 : f32 to vector<8x128xf32>
    %23 = arith.cmpf ogt, %20, %22 : vector<8x128xf32>
    %24 = vector.broadcast %21 : f32 to vector<8x128xf32>
    %25 = arith.mulf %24, %20 : vector<8x128xf32>
    %26 = arith.select %23, %20, %25 : vector<8x128xi1>, vector<8x128xf32>
    %c272 = arith.constant 272 : index
    %c0_10 = arith.constant 0 : index
    %27 = vector.load %arg2[%c272, %c0_10] : memref<408x128xf32, #tpu.memory_space<vmem>>, vector<128x128xf32>
    %c400 = arith.constant 400 : index
    %c0_11 = arith.constant 0 : index
    %28 = vector.load %arg2[%c400, %c0_11] : memref<408x128xf32, #tpu.memory_space<vmem>>, vector<1x128xf32>
    %29 = arith.truncf %26 : vector<8x128xf32> to vector<8x128xbf16>
    %30 = arith.truncf %27 : vector<128x128xf32> to vector<128x128xbf16>
    %cst_12 = arith.constant dense<0.000000e+00> : vector<8x128xf32>
    %31 = tpu.matmul %29, %30, %cst_12 {dimension_numbers = #tpu.dot_dimension_numbers<[1], [0], [0], [1], [0, 0, 1, 1], [], []>} : vector<8x128xbf16>, vector<128x128xbf16>, vector<8x128xf32> -> vector<8x128xf32>
    %32 = vector.broadcast %28 : vector<1x128xf32> to vector<8x128xf32>
    %33 = arith.addf %31, %32 : vector<8x128xf32>
    %34 = tpu.iota {dimensions = array<i32: 1>} : vector<8x128xi32>
    %c8_i32 = arith.constant 8 : i32
    %35 = vector.broadcast %c8_i32 : i32 to vector<8x128xi32>
    %36 = arith.cmpi slt, %34, %35 : vector<8x128xi32>
    %cst_13 = arith.constant -1.000000e+30 : f32
    %37 = vector.broadcast %cst_13 : f32 to vector<8x128xf32>
    %38 = arith.select %36, %33, %37 : vector<8x128xi1>, vector<8x128xf32>
    %cst_14 = arith.constant dense<0xFF800000> : vector<8xf32>
    %39 = vector.multi_reduction <maximumf>, %38, %cst_14 [1] : vector<8x128xf32> to vector<8xf32>
    %40 = vector.shape_cast %39 : vector<8xf32> to vector<8x1xf32>
    %41 = vector.broadcast %40 : vector<8x1xf32> to vector<8x128xf32>
    %42 = arith.subf %38, %41 : vector<8x128xf32>
    %43 = math.exp %42 : vector<8x128xf32>
    %cst_15 = arith.constant dense<0.000000e+00> : vector<8xf32>
    %44 = vector.multi_reduction <add>, %43, %cst_15 [1] : vector<8x128xf32> to vector<8xf32>
    %45 = vector.shape_cast %44 : vector<8xf32> to vector<8x1xf32>
    %46 = vector.broadcast %45 : vector<8x1xf32> to vector<8x128xf32>
    %47 = arith.divf %43, %46 : vector<8x128xf32>
    %c0_16 = arith.constant 0 : index
    %c0_17 = arith.constant 0 : index
    %48 = vector.load %arg4[%c0_16, %c0_17] : memref<8x128xf32, #tpu.memory_space<vmem>>, vector<8x128xf32>
    tpu.vector_store %arg4[%c0_16, %c0_17], %47 {strides = array<i32>} : memref<8x128xf32, #tpu.memory_space<vmem>>, vector<8x128xf32>,
    return
  }
  func.func @transform_0(%arg0: i32) -> (i32, i32) {
    %c0_i32 = arith.constant 0 : i32
    %c0_i32_0 = arith.constant 0 : i32
    return %arg0, %c0_i32 : i32, i32
  }
  func.func @transform_1(%arg0: i32) -> (i32, i32) {
    %c0_i32 = arith.constant 0 : i32
    %c0_i32_0 = arith.constant 0 : i32
    %c0_i32_1 = arith.constant 0 : i32
    return %c0_i32, %c0_i32_0 : i32, i32
  }
  func.func @transform_2(%arg0: i32) -> i32 {
    %c0_i32 = arith.constant 0 : i32
    %c0_i32_0 = arith.constant 0 : i32
    return %c0_i32 : i32
  }
  func.func @transform_3(%arg0: i32) -> (i32, i32) {
    %c0_i32 = arith.constant 0 : i32
    %c0_i32_0 = arith.constant 0 : i32
    return %arg0, %c0_i32 : i32, i32
  }
}

</mosaic_0001>

<bundles_post_ra>
// kernel: tpu_custom_call.1
= control target key start
LH: loop header
LB: loop body
LE: loop exit
PB: predicated region body
PF: predicated region fallthrough
CT: control target
= control target key end

     0   :  { %8 = vsyncpa [#allocation3], 0  ;;  %s600_s0 = inlined_call_operand.hbm [shape: f32[8,128], index: 0, kind: input, shape index: {}]   ;;  %s601_s1 = inlined_call_operand.hbm [shape: f32[408,128], index: 1, kind: input, shape index: {}]   ;;  %s602_s2 = inlined_call_operand.vmem [shape: f32[2], index: 2, kind: input, shape index: {}]   ;;  %s603_s3 = inlined_call_operand.hbm [shape: f32[8,128], index: 3, kind: output, shape index: {}]  }
   0x1   :  { %9 = vsyncpa [#allocation7], 0 }
   0x2   :  { %10 = vsyncpa [#allocation5], 0 }
   0x3   :  { %11 = vsyncpa [#allocation4], 0  ;;  %s496_s12 = smov [#allocation2]   ;;  %s497_s14 = smov [#allocation6]  }
   0x4   :  { %s18_s13 = sshll.u32 %s496_s12, 4  ;;  %s27_s15 = sshll.u32 %s497_s14, 4  ;;  %s19_s13 = int_to_ptr.vmem [resolvable:$true] %s18_s13  ;;  %s524_s15 = int_to_ptr.vmem [resolvable:$true] %s27_s15 }
   0x5   :  { %s410_s18 = scalar_lea.hbm %s600_s0, 128 }
   0x6   :  { %p411_p0 = scmp.ne.s32.totalorder %s600_s0, %s410_s18  ;;  %p414_p1 = scmp.lt.u32.totalorder %s410_s18, %s600_s0 }
   0x8   :  { %p416_p2 = pnand %p414_p1, %p411_p0 }
   0xa   :  { %419 = shalt.err (!%p416_p2)
}
   0xb   :  { %s420_s23 = scalar_lea.vmem %s19_s13, 128  ;;  %p425_p4 = scmp.lt.s32.totalorder %s19_s13, %s19_s13 }
   0xc   :  { %p421_p3 = scmp.ne.s32.totalorder %s19_s13, %s420_s23  ;;  %p426_p5 = scmp.lt.s32.totalorder %s420_s23, %s420_s23 }
   0xe   :  { %p427_p6 = por %p426_p5, %p425_p4 }
  0x10   :  { %p428_p7 = pnand %p427_p6, %p421_p3 }
  0x12   :  { %431 = shalt.err (!%p428_p7)
}
  0x13   :  { %21 = dma.hbm_to_vmem [thread:$0]  %s600_s0, 128, %s19_s13, [#allocation3]  }
  0x14   :  { %s432_s28 = scalar_lea.hbm %s601_s1, 6528 }
  0x15   :  { %p433_p8 = scmp.ne.s32.totalorder %s601_s1, %s432_s28  ;;  %p436_p9 = scmp.lt.u32.totalorder %s432_s28, %s601_s1 }
  0x17   :  { %p438_p10 = pnand %p436_p9, %p433_p8 }
  0x19   :  { %441 = shalt.err (!%p438_p10)
}
  0x1a   :  { %s442_s6 = scalar_lea.vmem %s524_s15, 6528  ;;  %p447_p12 = scmp.lt.s32.totalorder %s524_s15, %s524_s15 }
  0x1b   :  { %p443_p11 = scmp.ne.s32.totalorder %s524_s15, %s442_s6  ;;  %p448_p13 = scmp.lt.s32.totalorder %s442_s6, %s442_s6 }
  0x1d   :  { %p449_p0 = por %p448_p13, %p447_p12 }
  0x1f   :  { %p450_p1 = pnand %p449_p0, %p443_p11 }
  0x21   :  { %453 = shalt.err (!%p450_p1)
}
  0x22   :  { %s498_s0 = smov 128   ;;  %s499_s7 = smov 8  }
  0x23   :  { %33 = dma.hbm_to_vmem [thread:$0]  %s601_s1, 6528, %s524_s15, [#allocation7], %s498_s0, %s498_s0, %s499_s7  }
  0x24   :  { %s40_s12 = sshll.u32 %s602_s2, 4  ;;  %s41_s12 = int_to_ptr.vmem [resolvable:$true] %s40_s12 }
  0x25   :  { %s454_s13 = scalar_lea.vmem %s41_s12, 16  ;;  %p459_p3 = scmp.lt.s32.totalorder %s41_s12, %s41_s12 }
  0x26   :  { %p455_p2 = scmp.ne.s32.totalorder %s41_s12, %s454_s13  ;;  %p460_p4 = scmp.lt.s32.totalorder %s454_s13, %s454_s13 }
  0x28   :  { %p461_p5 = por %p460_p4, %p459_p3 }
  0x2a   :  { %p462_p6 = pnand %p461_p5, %p455_p2 }
  0x2c   :  { %465 = shalt.err (!%p462_p6)
}
  0x2d   :  { %s500_s14 = smov [#allocation8]  }
  0x2e   :  { %43 = dma.vmem_to_smem %s41_s12, 16, %s500_s14, [#allocation5]  }
  0x2f   :  { %488 = dma.done.wait [#allocation3], 128  }
  0x30   :  { %489 = vsyncadd [#allocation3], 4294967168 }
  0x31   :  { %490 = dma.done.wait [#allocation7], 6528  }
  0x32   :  { %491 = vsyncadd [#allocation7], 4294960768 }
  0x33   :  { %492 = dma.done.wait [#allocation5], 16  }
  0x34   :  { %493 = vsyncadd [#allocation5], 4294967280 }
  0x35   :  { %53 = sfence }
  0x36   :  { %v56_v0 = vld [vmem:[#allocation6] sm:$0xff]  ;;  %v57_v1 = vld [vmem:[#allocation6 + $0x8] sm:$0xff]  ;;  %v58_v2 = vld [vmem:[#allocation6 + $0x10] sm:$0xff]  ;;  %v501_v3 = vmov 0.0   ;;  %vm502_vm0 = vmmov 0   ;;  %s126_s1 = sld [smem:[#allocation8]] }
  0x37   :  { %338 = vmatprep.subr.bf16.mxu0 %v501_v3  ;;  %v74_v4 = vpack.c.bf16 %v57_v1, %v56_v0  ;;  %v59_v5 = vld [vmem:[#allocation6 + $0x18] sm:$0xff]  ;;  %354 = vmatprep.mubr.msk.bf16.mxu0 %vm502_vm0, %v501_v3  ;;  %v60_v7 = vld [vmem:[#allocation6 + $0x20] sm:$0xff]  ;;  %v61_v8 = vld [vmem:[#allocation6 + $0x28] sm:$0xff]  ;;  %s309_s2 = sld [smem:[#allocation8 + $0x1]]  ;;  %s503_s15 = smov [#allocation9]  }
  0x38   :  { %358 = vmatprep.subr.bf16.mxu1 %v501_v3  ;;  %374 = vmatprep.mubr.msk.bf16.mxu1 %vm502_vm0, %v501_v3  ;;  %v75_v6 = vpack.c.bf16 %v59_v5, %v58_v2  ;;  %v131_v9 = vld [vmem:[#allocation6 + $0x88] sm:$0xff]  ;;  %v132_v10 = vld [vmem:[#allocation6 + $0x90] sm:$0xff]  ;;  %v133_v11 = vld [vmem:[#allocation6 + $0x98] sm:$0xff]  ;;  %v76_v13 = vpack.c.bf16 %v61_v8, %v60_v7  ;;  %s296_s16 = sshll.u32 %s503_s15, 4  ;;  %s297_s16 = int_to_ptr.vmem [resolvable:$true] %s296_s16 }
  0x39   :  { %339 = vmatpush3.bf16.msra.mxu0 %v74_v4  ;;  %v134_v12 = vld [vmem:[#allocation6 + $0xa0] sm:$0xff]  ;;  %v149_v14 = vpack.c.bf16 %v132_v10, %v131_v9  ;;  %v62_v15 = vld [vmem:[#allocation6 + $0x30] sm:$0xff]  ;;  %v63_v16 = vld [vmem:[#allocation6 + $0x38] sm:$0xff]  ;;  %s466_s17 = scalar_lea.vmem %s297_s16, 128  ;;  %p471_p8 = scmp.lt.s32.totalorder %s297_s16, %s297_s16 }
  0x3a   :  { %340 = vmatprep.subr.bf16.mxu0 %v501_v3  ;;  %v150_v17 = vpack.c.bf16 %v134_v12, %v133_v11  ;;  %v135_v18 = vld [vmem:[#allocation6 + $0xa8] sm:$0xff]  ;;  %v136_v19 = vld [vmem:[#allocation6 + $0xb0] sm:$0xff]  ;;  %v77_v20 = vpack.c.bf16 %v63_v16, %v62_v15  ;;  %v64_v21 = vld [vmem:[#allocation6 + $0x40] sm:$0xff]  ;;  %p467_p7 = scmp.ne.s32.totalorder %s297_s16, %s466_s17  ;;  %p472_p9 = scmp.lt.s32.totalorder %s466_s17, %s466_s17 }
  0x3b   :  { %359 = vmatpush3.bf16.msra.mxu1 %v149_v14  ;;  %v65_v22 = vld [vmem:[#allocation6 + $0x48] sm:$0xff]  ;;  %v151_v23 = vpack.c.bf16 %v136_v19, %v135_v18  ;;  %v137_v24 = vld [vmem:[#allocation6 + $0xb8] sm:$0xff]  ;;  %v138_v25 = vld [vmem:[#allocation6 + $0xc0] sm:$0xff] }
  0x3c   :  { %360 = vmatprep.subr.bf16.mxu1 %v501_v3  ;;  %v78_v26 = vpack.c.bf16 %v65_v22, %v64_v21  ;;  %v66_v27 = vld [vmem:[#allocation6 + $0x50] sm:$0xff]  ;;  %v67_v28 = vld [vmem:[#allocation6 + $0x58] sm:$0xff]  ;;  %v152_v29 = vpack.c.bf16 %v138_v25, %v137_v24  ;;  %v139_v30 = vld [vmem:[#allocation6 + $0xc8] sm:$0xff]  ;;  %v128_v8 = vstv %s126_s1  ;;  %p473_p10 = por %p472_p9, %p471_p8 }
  0x3d   :  { %341 = vmatpush3.bf16.msra.mxu0 %v75_v6  ;;  %v140_v31 = vld [vmem:[#allocation6 + $0xd0] sm:$0xff]  ;;  %v79_v32 = vpack.c.bf16 %v67_v28, %v66_v27  ;;  %v68_v33 = vld [vmem:[#allocation6 + $0x60] sm:$0xff]  ;;  %v69_v34 = vld [vmem:[#allocation6 + $0x68] sm:$0xff]  ;;  %v203_v24 = vstv %s309_s2 }
  0x3e   :  { %342 = vmatprep.subr.bf16.mxu0 %v501_v3  ;;  %v153_v35 = vpack.c.bf16 %v140_v31, %v139_v30  ;;  %v141_v36 = vld [vmem:[#allocation6 + $0xd8] sm:$0xff]  ;;  %v142_v37 = vld [vmem:[#allocation6 + $0xe0] sm:$0xff]  ;;  %v80_v38 = vpack.c.bf16 %v69_v34, %v68_v33  ;;  %v70_v39 = vld [vmem:[#allocation6 + $0x70] sm:$0xff]  ;;  %p474_p11 = pnand %p473_p10, %p467_p7 }
  0x3f   :  { %361 = vmatpush3.bf16.msra.mxu1 %v150_v17  ;;  %v71_v40 = vld [vmem:[#allocation6 + $0x78] sm:$0xff]  ;;  %v154_v41 = vpack.c.bf16 %v142_v37, %v141_v36  ;;  %v143_v45 = vld [vmem:[#allocation6 + $0xe8] sm:$0xff]  ;;  %v144_v46 = vld [vmem:[#allocation6 + $0xf0] sm:$0xff] }
  0x40   :  { %362 = vmatprep.subr.bf16.mxu1 %v501_v3  ;;  %v81_v42 = vpack.c.bf16 %v71_v40, %v70_v39  ;;  %v55_v43 = vld [vmem:[#allocation2] sm:$0xff]  ;;  %v155_v47 = vpack.c.bf16 %v144_v46, %v143_v45  ;;  %v146_v49 = vld [vmem:[#allocation6 + $0x100] sm:$0xff]  ;;  %v206_v51 = vld [vmem:[#allocation6 + $0x110] sm:$0xff] }
  0x41   :  { %343 = vmatpush3.bf16.msra.mxu0 %v76_v13  ;;  %v73_v44 = vpack.c.bf16 %v55_v43, %v55_v43  ;;  %v145_v48 = vld [vmem:[#allocation6 + $0xf8] sm:$0xff]  ;;  %v208_v53 = vld [vmem:[#allocation6 + $0x120] sm:$0xff]  ;;  %v209_v55 = vld [vmem:[#allocation6 + $0x128] sm:$0xff] }
  0x42   :  { %344 = vmatprep.subr.bf16.mxu0 %v501_v3  ;;  %v156_v50 = vpack.c.bf16 %v146_v49, %v145_v48  ;;  %v207_v52 = vld [vmem:[#allocation6 + $0x118] sm:$0xff]  ;;  %v225_v56 = vpack.c.bf16 %v209_v55, %v208_v53  ;;  %v210_v57 = vld [vmem:[#allocation6 + $0x130] sm:$0xff]  ;;  %v212_v60 = vld [vmem:[#allocation6 + $0x140] sm:$0xff] }
  0x43   :  { %363 = vmatpush3.bf16.msra.mxu1 %v151_v23  ;;  %v224_v54 = vpack.c.bf16 %v207_v52, %v206_v51  ;;  %v211_v58 = vld [vmem:[#allocation6 + $0x138] sm:$0xff]  ;;  %v213_v61 = vld [vmem:[#allocation6 + $0x148] sm:$0xff]  ;;  %v214_v63 = vld [vmem:[#allocation6 + $0x150] sm:$0xff] }
  0x44   :  { %364 = vmatprep.subr.bf16.mxu1 %v501_v3  ;;  %v226_v59 = vpack.c.bf16 %v211_v58, %v210_v57  ;;  %v227_v62 = vpack.c.bf16 %v213_v61, %v212_v60  ;;  %v215_v0 = vld [vmem:[#allocation6 + $0x158] sm:$0xff]  ;;  %v216_v2 = vld [vmem:[#allocation6 + $0x160] sm:$0xff]  ;;  %v217_v4 = vld [vmem:[#allocation6 + $0x168] sm:$0xff] }
  0x45   :  { %345 = vmatpush3.bf16.msra.mxu0 %v77_v20  ;;  %v228_v1 = vpack.c.bf16 %v215_v0, %v214_v63  ;;  %v229_v5 = vpack.c.bf16 %v217_v4, %v216_v2  ;;  %v307_v6 = vld [vmem:[#allocation6 + $0x80] ss:$0 sm:$0xff]  ;;  %v218_v16 = vld [vmem:[#allocation6 + $0x170] sm:$0xff]  ;;  %v219_v17 = vld [vmem:[#allocation6 + $0x178] sm:$0xff] }
  0x46   :  { %346 = vmatprep.subr.bf16.mxu0 %v501_v3  ;;  %v230_v18 = vpack.c.bf16 %v219_v17, %v218_v16  ;;  %v220_v19 = vld [vmem:[#allocation6 + $0x180] sm:$0xff]  ;;  %v221_v20 = vld [vmem:[#allocation6 + $0x188] sm:$0xff] }
  0x47   :  { %365 = vmatpush3.bf16.msra.mxu1 %v152_v29  ;;  %v231_v21 = vpack.c.bf16 %v221_v20, %v220_v19  ;;  %v308_v22 = vld [vmem:[#allocation6 + $0x108] ss:$0 sm:$0xff] }
  0x48   :  { %366 = vmatprep.subr.bf16.mxu1 %v501_v3 }
  0x49   :  { %347 = vmatpush3.bf16.msra.mxu0 %v78_v26 }
  0x4a   :  { %348 = vmatprep.subr.bf16.mxu0 %v501_v3 }
  0x4b   :  { %367 = vmatpush3.bf16.msra.mxu1 %v153_v35 }
  0x4c   :  { %368 = vmatprep.subr.bf16.mxu1 %v501_v3 }
  0x4d   :  { %349 = vmatpush3.bf16.msra.mxu0 %v79_v32  ;;  %v276_v32 = vlaneseq }
  0x4e   :  { %350 = vmatprep.subr.bf16.mxu0 %v501_v3 }
  0x4f   :  { %369 = vmatpush3.bf16.msra.mxu1 %v154_v41  ;;  %v277_v33 = vand.u32 127, %v276_v32 }
  0x50   :  { %370 = vmatprep.subr.bf16.mxu1 %v501_v3 }
  0x51   :  { %351 = vmatpush3.bf16.msra.mxu0 %v80_v38  ;;  %vm278_vm3 = vcmp.lt.s32.totalorder %v277_v33, 8 }
  0x52   :  { %352 = vmatprep.subr.bf16.mxu0 %v501_v3 }
  0x53   :  { %371 = vmatpush3.bf16.msra.mxu1 %v155_v47 }
  0x54   :  { %372 = vmatprep.subr.bf16.mxu1 %v501_v3 }
  0x55   :  { %353 = vmatpush3.bf16.msra.mxu0 %v81_v42 }
  0x56   :  { %378 = vmatprep.subr.bf16.mxu0 %v501_v3 }
  0x57   :  { %373 = vmatpush3.bf16.msra.mxu1 %v156_v50 }
  0x58   :  { %355 = vmatmul.mubr.bf16.vlgmr.msra.gmra.mrb[0].mxu0 %v73_v44 }
  0x59   :  { %394 = vmatprep.mubr.msk.bf16.mxu0 %vm502_vm0, %v501_v3  ;;  %379 = vmatpush3.bf16.msra.mxu0 %v224_v54 }
  0x5a   :  { %380 = vmatprep.subr.bf16.mxu0 %v501_v3 }
  0x5d   :  { %381 = vmatpush3.bf16.msra.mxu0 %v225_v56 }
  0x5e   :  { %382 = vmatprep.subr.bf16.mxu0 %v501_v3 }
  0x61   :  { %383 = vmatpush3.bf16.msra.mxu0 %v226_v59 }
  0x62   :  { %384 = vmatprep.subr.bf16.mxu0 %v501_v3 }
  0x65   :  { %385 = vmatpush3.bf16.msra.mxu0 %v227_v62 }
  0x66   :  { %386 = vmatprep.subr.bf16.mxu0 %v501_v3 }
  0x69   :  { %387 = vmatpush3.bf16.msra.mxu0 %v228_v1 }
  0x6a   :  { %388 = vmatprep.subr.bf16.mxu0 %v501_v3 }
  0x6d   :  { %389 = vmatpush3.bf16.msra.mxu0 %v229_v5 }
  0x6e   :  { %390 = vmatprep.subr.bf16.mxu0 %v501_v3 }
  0x71   :  { %391 = vmatpush3.bf16.msra.mxu0 %v230_v18 }
  0x72   :  { %392 = vmatprep.subr.bf16.mxu0 %v501_v3  ;;  %v310_v3 = vld [vmem:[#allocation6 + $0x190] ss:$0 sm:$0xff] }
  0x75   :  { %393 = vmatpush3.bf16.msra.mxu0 %v231_v21 }
 0x12b   :  { %v120_v7 = vpop.f32.mrb[0].mxu0 }
 0x12c   :  { %v121_v9 = vadd.f32 %v307_v6, %v120_v7  ;;  %v356_v10 = vpop.f32.mrb[1].mxu0 }
 0x12d   :  { %v123_v11 = vpop.f32.mrb[2].mxu0 }
 0x12e   :  { %vm127_vm1 = vcmp.gt.f32.partialorder %v121_v9, 0.0  ;;  %v129_v12 = vmul.f32 %v128_v8, %v121_v9  ;;  %v357_v13 = vpop.f32.mrb[3].mxu0 }
 0x130   :  { %v130_v14 = vsel %vm127_vm1, %v121_v9, %v129_v12 }
 0x131   :  { %v148_v15 = vpack.c.bf16 %v130_v14, %v130_v14 }
 0x133   :  { %375 = vmatmul.mubr.bf16.vlgmr.msra.gmra.mrb[0].mxu1 %v148_v15 }
 0x206   :  { %v195_v23 = vpop.f32.mrb[0].mxu1 }
 0x207   :  { %v196_v25 = vadd.f32 %v308_v22, %v195_v23  ;;  %v376_v26 = vpop.f32.mrb[1].mxu1 }
 0x208   :  { %v198_v27 = vpop.f32.mrb[2].mxu1 }
 0x209   :  { %vm202_vm2 = vcmp.gt.f32.partialorder %v196_v25, 0.0  ;;  %v204_v28 = vmul.f32 %v203_v24, %v196_v25  ;;  %v377_v29 = vpop.f32.mrb[3].mxu1 }
 0x20b   :  { %v205_v30 = vsel %vm202_vm2, %v196_v25, %v204_v28 }
 0x20c   :  { %v223_v31 = vpack.c.bf16 %v205_v30, %v205_v30 }
 0x20e   :  { %395 = vmatmul.mubr.bf16.vlgmr.msra.gmra.mrb[4].mxu0 %v223_v31 }
 0x2e1   :  { %v270_v34 = vpop.f32.mrb[4].mxu0 }
 0x2e2   :  { %v271_v35 = vadd.f32 %v310_v3, %v270_v34  ;;  %v396_v36 = vpop.f32.mrb[5].mxu0 }
 0x2e3   :  { %v273_v37 = vpop.f32.mrb[6].mxu0 }
 0x2e4   :  { %v397_v38 = vpop.f32.mrb[7].mxu0  ;;  %v279_v39 = vsel %vm278_vm3, %v271_v35, -1e+30 }
 0x2e5   :  { %280 = vmax.xlane.f32.xlu0 %v279_v39 }
 0x372   :  { %v281_v40 = vpop.xlane.xlu0 %280 }
 0x373   :  { %v282_v41 = vsub.f32 %v279_v39, %v281_v40 }
 0x375   :  { %v283_v42 = vmul.f32 1.442695, %v282_v41 }
 0x377   :  { %406 = vpow2.f32 %v283_v42 }
 0x381   :  { %v407_v43 = vpop.eup %406 }
 0x382   :  { %285 = vadd.xlane.f32.xlu0 %v407_v43 }
 0x40f   :  { %v286_v44 = vpop.xlane.xlu0 %285 }
 0x410   :  { %408 = vrcp.f32 %v286_v44 }
 0x41a   :  { %v409_v45 = vpop.eup %408 }
 0x41b   :  { %v288_v46 = vmul.f32 %v409_v45, %v407_v43 }
 0x41d   :  { %289 = vst [vmem:[#allocation9] sm:$0xff] %v288_v46 }
 0x41e   :  { %477 = shalt.err (!%p474_p11)
}
 0x41f   :  { %s478_s20 = scalar_lea.hbm %s603_s3, 128 }
 0x420   :  { %p479_p12 = scmp.ne.s32.totalorder %s603_s3, %s478_s20  ;;  %p482_p13 = scmp.lt.u32.totalorder %s478_s20, %s603_s3 }
 0x422   :  { %p484_p0 = pnand %p482_p13, %p479_p12 }
 0x424   :  { %487 = shalt.err (!%p484_p0)
}
 0x425   :  { %299 = dma.vmem_to_hbm [thread:$0]  %s297_s16, 128, %s603_s3, [#allocation4]  }
 0x426   :  { %494 = dma.done.wait [#allocation4], 128  }
 0x427   :  { %495 = vsyncadd [#allocation4], 4294967168 }
 0x428   :  { %303 = vsyncpa [#allocation3], 1 }
 0x429   :  { %304 = vsyncpa [#allocation7], 1 }
 0x42a   :  { %305 = vsyncpa [#allocation4], 1 }
 0x42b   :  { %306 = vsyncpa [#allocation5], 1 }

</bundles_post_ra>
